<compile_context>
chip_gen: v7x
topology: tpu7x:2x2x1
jax: 0.10.0
libtpu: 0.0.40
codegen_flags: <defaults>
</compile_context>

<pallas_src>
import numpy as np
import jax
import jax.numpy as jnp
from jax.experimental import pallas as pl
from jax.experimental.pallas import tpu as pltpu

# ---- problem sizes (scaled-down version of the PyTorch module) -------------
B = 2                # batch
C = 8                # channels         (orig: 290, since 501120 = 290 * 12^3)
D, H, W = 10, 8, 6   # input spatial    (arbitrary; adaptive pool handles it)
P = 4                # pool output per spatial dim (orig: 12)
P2, P3 = P * P, P * P * P
HW = H * W
FEAT = C * P3        # 512  (orig: 501120); lane-aligned (multiple of 128)
HID = 256            # fc1 width (orig: 960 -> pad to 1024 at real scale)
OUT = 6              # 6-DoF output
OUT_PAD = 128        # lane-dense fc2 output; padded columns are zero
K_TILE = 128         # FEAT (reduction) tile streamed through the fc1 kernel
N_TILE = 128         # HID tile -> "parallel" grid axis (v7x 2-TC friendly)

assert FEAT % K_TILE == 0 and HID % N_TILE == 0


def _adaptive_pool_matrix_1d(n_in, n_out):
    """(n_in, n_out) matrix M with M[i, b] = 1/len(bin_b) if i in bin_b."""
    m = np.zeros((n_in, n_out), dtype=np.float32)
    for b in range(n_out):
        start = (b * n_in) // n_out
        end = -(-((b + 1) * n_in) // n_out)  # ceil
        m[start:end, b] = 1.0 / (end - start)
    return m


# ---------------------------------------------------------------------------
# Kernel 1: factorized AdaptiveAvgPool3d, per (batch, channel).
#   x_ref:   (D, H*W)      one channel's volume
#   mdt_ref: (P, D)        depth pooling matrix (transposed)
#   mhw_ref: (H*W, P^2)    kron(M_h, M_w) -- only the small (H,W) factor
#   o_ref:   (P, P^2)      pooled[pd, ph*P+pw]
def _pool_kernel(x_ref, mdt_ref, mhw_ref, o_ref):
    u = jnp.dot(mdt_ref[...], x_ref[...],
                preferred_element_type=jnp.float32)          # (P, HW)
    o_ref[...] = jnp.dot(u, mhw_ref[...],
                         preferred_element_type=jnp.float32)  # (P, P2)


# ---------------------------------------------------------------------------
# Kernel 2: fc1 = relu(feat @ w1 + b1), K-streamed with f32 accumulator.
# grid = (HID // N_TILE  ["parallel"],  FEAT // K_TILE  ["arbitrary"])
def _fc1_kernel(feat_ref, w1_ref, b1_ref, h_ref, acc_ref):
    k = pl.program_id(1)

    @pl.when(k == 0)
    def _():
        acc_ref[...] = jnp.zeros_like(acc_ref)

    # bf16 weight tile streamed from HBM; upcast in VMEM, accumulate in f32.
    acc_ref[...] += jnp.dot(feat_ref[...],
                            w1_ref[...].astype(jnp.float32),
                            preferred_element_type=jnp.float32)

    @pl.when(k == pl.num_programs(1) - 1)
    def _():
        h_ref[...] = jnp.maximum(acc_ref[...] + b1_ref[...], 0.0)


# ---------------------------------------------------------------------------
# Kernel 3: out = tanh(h @ w2 + b2), lane-padded to OUT_PAD columns.
def _fc2_kernel(h_ref, w2_ref, b2_ref, o_ref):
    o_ref[...] = jnp.tanh(
        jnp.dot(h_ref[...], w2_ref[...],
                preferred_element_type=jnp.float32) + b2_ref[...])


# ---------------------------------------------------------------------------
def lrb_forward(x, md, mhw, w1_bf16, b1, w2p, b2p):
    """x: (B, C, D, H, W) f32.  Returns (B, OUT) f32."""
    Bx, Cx, Dx, Hx, Wx = x.shape
    hw = Hx * Wx
    x4 = x.reshape(Bx, Cx, Dx, hw)          # free reshape (contiguous)
    mdt = md.T                               # (P, D)

    # --- adaptive average pool (factorized) --------------------------------
    pooled = pl.pallas_call(
        _pool_kernel,
        out_shape=jax.ShapeDtypeStruct((Bx, Cx, P, P2), jnp.float32),
        grid_spec=pltpu.PrefetchScalarGridSpec(
            num_scalar_prefetch=0,
            grid=(Bx, Cx),
            in_specs=[
                pl.BlockSpec((None, None, Dx, hw), lambda b, c: (b, c, 0, 0)),
                pl.BlockSpec((P, Dx), lambda b, c: (0, 0)),
                pl.BlockSpec((hw, P2), lambda b, c: (0, 0)),
            ],
            out_specs=pl.BlockSpec((None, None, P, P2),
                                   lambda b, c: (b, c, 0, 0)),
        ),
        compiler_params=pltpu.CompilerParams(
            dimension_semantics=("parallel", "parallel")),
    )(x4, mdt, mhw)

    # row-major flatten of (C, P, P, P) == torch's x.view(B, -1)
    feat = pooled.reshape(Bx, Cx * P3)       # (B, FEAT) f32

    # --- fc1: whole batch in M, w1 streamed once over K, N tiles parallel ---
    num_n = HID // N_TILE
    num_k = FEAT // K_TILE
    h = pl.pallas_call(
        _fc1_kernel,
        out_shape=jax.ShapeDtypeStruct((Bx, HID), jnp.float32),
        grid_spec=pltpu.PrefetchScalarGridSpec(
            num_scalar_prefetch=0,
            grid=(num_n, num_k),
            in_specs=[
                pl.BlockSpec((Bx, K_TILE), lambda n, k: (0, k)),      # feat
                pl.BlockSpec((K_TILE, N_TILE), lambda n, k: (k, n)),  # w1 bf16
                pl.BlockSpec((1, N_TILE), lambda n, k: (0, n)),       # b1
            ],
            out_specs=pl.BlockSpec((Bx, N_TILE), lambda n, k: (0, n)),
            scratch_shapes=[pltpu.VMEM((Bx, N_TILE), jnp.float32)],
        ),
        compiler_params=pltpu.CompilerParams(
            dimension_semantics=("parallel", "arbitrary")),
    )(feat, w1_bf16, b1.reshape(1, HID))

    # --- fc2 + tanh (lane-padded output, exact since pads are zero) ---------
    out_pad = pl.pallas_call(
        _fc2_kernel,
        out_shape=jax.ShapeDtypeStruct((Bx, OUT_PAD), jnp.float32),
        grid_spec=pltpu.PrefetchScalarGridSpec(
            num_scalar_prefetch=0,
            grid=(1,),
            in_specs=[
                pl.BlockSpec((Bx, HID), lambda i: (0, 0)),
                pl.BlockSpec((HID, OUT_PAD), lambda i: (0, 0)),
                pl.BlockSpec((1, OUT_PAD), lambda i: (0, 0)),
            ],
            out_specs=pl.BlockSpec((Bx, OUT_PAD), lambda i: (0, 0)),
        ),
        compiler_params=pltpu.CompilerParams(
            dimension_semantics=("arbitrary",)),
    )(h, w2p, b2p)

    return out_pad[:, :OUT]


def lrb_reference(x, md, mh, mw, w1, b1, w2, b2):
    """Pure-JAX reference matching the PyTorch forward."""
    pooled = jnp.einsum("bcdhw,dp,hq,wr->bcpqr", x, md, mh, mw)  # AdaptiveAvgPool3d
    feat = pooled.reshape(x.shape[0], -1)                        # x.view(B, -1)
    hcc = jnp.maximum(feat @ w1 + b1, 0.0)                       # relu(fc1)
    return jnp.tanh(hcc @ w2 + b2)                               # tanh(fc2)


if __name__ == "__main__":
    key = jax.random.PRNGKey(0)
    kx, kw1, kb1, kw2, kb2 = jax.random.split(key, 5)

    x = jax.random.normal(kx, (B, C, D, H, W), dtype=jnp.float32)

    # Linear init: uniform(-1/sqrt(fan_in), 1/sqrt(fan_in)), stored as (in, out).
    bnd1 = float(1.0 / np.sqrt(FEAT))
    w1 = jax.random.uniform(kw1, (FEAT, HID), jnp.float32, -bnd1, bnd1)
    b1 = jax.random.uniform(kb1, (HID,), jnp.float32, -bnd1, bnd1)
    bnd2 = float(1.0 / np.sqrt(HID))
    w2 = jax.random.uniform(kw2, (HID, OUT), jnp.float32, -bnd2, bnd2)
    b2 = jax.random.uniform(kb2, (OUT,), jnp.float32, -bnd2, bnd2)

    # bf16 weight stream for fc1 (the HBM-bandwidth-dominated operand).
    w1_bf16 = w1.astype(jnp.bfloat16)

    # zero-padded lane-dense fc2 params (padding contributes exactly zero).
    w2p = jnp.zeros((HID, OUT_PAD), jnp.float32).at[:, :OUT].set(w2)
    b2p = jnp.zeros((1, OUT_PAD), jnp.float32).at[0, :OUT].set(b2)

    # factorized pooling operands (no S x P^3 Kronecker matrix).
    md_np = _adaptive_pool_matrix_1d(D, P)
    mh_np = _adaptive_pool_matrix_1d(H, P)
    mw_np = _adaptive_pool_matrix_1d(W, P)
    md = jnp.asarray(md_np)                      # (D, P)
    mhw = jnp.asarray(np.kron(mh_np, mw_np))     # (H*W, P^2) only

    out = lrb_forward(x, md, mhw, w1_bf16, b1, w2p, b2p)
    out = jax.block_until_ready(out)

    # Reference uses the same bf16-rounded w1 so the comparison tests the
    # kernel, not the quantization.
    ref = lrb_reference(x, md, jnp.asarray(mh_np), jnp.asarray(mw_np),
                        w1_bf16.astype(jnp.float32), b1, w2, b2)

    assert out.shape == (B, OUT)
    np.testing.assert_allclose(np.asarray(out), np.asarray(ref),
                               rtol=5e-4, atol=5e-5)
    print("KERNEL_OK")
</pallas_src>

<mosaic_0001>
module attributes {stable_mosaic.version = 11 : i64} {
  func.func @_pool_kernel(%arg0: i32, %arg1: i32, %arg2: memref<1x1x10x48xf32, #tpu.memory_space<vmem>>, %arg3: memref<4x10xf32, #tpu.memory_space<vmem>>, %arg4: memref<48x16xf32, #tpu.memory_space<vmem>>, %arg5: memref<1x1x4x16xf32, #tpu.memory_space<vmem>>) attributes {dimension_semantics = [#tpu.dimension_semantics<parallel>, #tpu.dimension_semantics<parallel>], iteration_bounds = array<i64: 2, 8>, scalar_prefetch = 0 : i64, scratch_operands = 0 : i64, tpu.core_type = #tpu.core_type<tc>, window_params = [{transform_indices = @transform_0, window_bounds = array<i64: 1, 1, 10, 48>}, {pipeline_mode = #tpu.pipeline_mode<synchronous>, transform_indices = @transform_1, window_bounds = array<i64: 4, 10>}, {pipeline_mode = #tpu.pipeline_mode<synchronous>, transform_indices = @transform_2, window_bounds = array<i64: 48, 16>}, {transform_indices = @transform_3, window_bounds = array<i64: 1, 1, 4, 16>}]} {
    %c0 = arith.constant 0 : index
    %c0_0 = arith.constant 0 : index
    %0 = vector.load %arg3[%c0, %c0_0] : memref<4x10xf32, #tpu.memory_space<vmem>>, vector<4x10xf32>
    %c0_1 = arith.constant 0 : index
    %c0_2 = arith.constant 0 : index
    %c0_3 = arith.constant 0 : index
    %c0_4 = arith.constant 0 : index
    %1 = vector.load %arg2[%c0_1, %c0_2, %c0_3, %c0_4] : memref<1x1x10x48xf32, #tpu.memory_space<vmem>>, vector<1x1x10x48xf32>
    %2 = vector.shape_cast %1 : vector<1x1x10x48xf32> to vector<10x48xf32>
    %cst = arith.constant dense<0.000000e+00> : vector<4x48xf32>
    %3 = tpu.matmul %0, %2, %cst {dimension_numbers = #tpu.dot_dimension_numbers<[1], [0], [0], [1], [0, 0, 1, 1], [], []>} : vector<4x10xf32>, vector<10x48xf32>, vector<4x48xf32> -> vector<4x48xf32>
    %c0_5 = arith.constant 0 : index
    %c0_6 = arith.constant 0 : index
    %4 = vector.load %arg4[%c0_5, %c0_6] : memref<48x16xf32, #tpu.memory_space<vmem>>, vector<48x16xf32>
    %cst_7 = arith.constant dense<0.000000e+00> : vector<4x16xf32>
    %5 = tpu.matmul %3, %4, %cst_7 {dimension_numbers = #tpu.dot_dimension_numbers<[1], [0], [0], [1], [0, 0, 1, 1], [], []>} : vector<4x48xf32>, vector<48x16xf32>, vector<4x16xf32> -> vector<4x16xf32>
    %c0_8 = arith.constant 0 : index
    %c0_9 = arith.constant 0 : index
    %c0_10 = arith.constant 0 : index
    %c0_11 = arith.constant 0 : index
    %6 = vector.load %arg5[%c0_8, %c0_9, %c0_10, %c0_11] : memref<1x1x4x16xf32, #tpu.memory_space<vmem>>, vector<1x1x4x16xf32>
    %7 = vector.shape_cast %6 : vector<1x1x4x16xf32> to vector<4x16xf32>
    %8 = vector.shape_cast %5 : vector<4x16xf32> to vector<1x1x4x16xf32>
    tpu.vector_store %arg5[%c0_8, %c0_9, %c0_10, %c0_11], %8 {strides = array<i32>} : memref<1x1x4x16xf32, #tpu.memory_space<vmem>>, vector<1x1x4x16xf32>,
    return
  }
  func.func @transform_0(%arg0: i32, %arg1: i32) -> (i32, i32, i32, i32) {
    %c0_i32 = arith.constant 0 : i32
    %c0_i32_0 = arith.constant 0 : i32
    %c0_i32_1 = arith.constant 0 : i32
    return %arg0, %arg1, %c0_i32, %c0_i32_0 : i32, i32, i32, i32
  }
  func.func @transform_1(%arg0: i32, %arg1: i32) -> (i32, i32) {
    %c0_i32 = arith.constant 0 : i32
    %c0_i32_0 = arith.constant 0 : i32
    %c0_i32_1 = arith.constant 0 : i32
    return %c0_i32, %c0_i32_0 : i32, i32
  }
  func.func @transform_2(%arg0: i32, %arg1: i32) -> (i32, i32) {
    %c0_i32 = arith.constant 0 : i32
    %c0_i32_0 = arith.constant 0 : i32
    %c0_i32_1 = arith.constant 0 : i32
    return %c0_i32, %c0_i32_0 : i32, i32
  }
  func.func @transform_3(%arg0: i32, %arg1: i32) -> (i32, i32, i32, i32) {
    %c0_i32 = arith.constant 0 : i32
    %c0_i32_0 = arith.constant 0 : i32
    %c0_i32_1 = arith.constant 0 : i32
    return %arg0, %arg1, %c0_i32, %c0_i32_0 : i32, i32, i32, i32
  }
}

</mosaic_0001>

<bundles_post_ra>
// kernel: tpu_custom_call.1
= control target key start
LH: loop header
LB: loop body
LE: loop exit
PB: predicated region body
PF: predicated region fallthrough
CT: control target
= control target key end

     0   :  { %8 = vsyncpa [#allocation3], 0  ;;  %s873_s0 = inlined_call_operand.vmem [shape: f32[2,8,10,48], index: 0, kind: input, shape index: {}]   ;;  %s874_s1 = inlined_call_operand.vmem [shape: f32[4,10], index: 1, kind: input, shape index: {}]   ;;  %s875_s2 = inlined_call_operand.vmem [shape: f32[48,16], index: 2, kind: input, shape index: {}]   ;;  %s876_s3 = inlined_call_operand.hbm [shape: f32[2,8,4,16], index: 3, kind: output, shape index: {}]  }
   0x1   :  { %10 = vsyncpa [#allocation3 + $0x1], 0  ;;  %s715_s12 = smov 0   ;;  %s717_s13 = smov 0  }
   0x2   :  { %s719_s14 = smov 0   ;;  %s721_s15 = smov 0  }
   0x3   :  { %s723_s16 = smov 0   ;;  %s725_s17 = smov 0  }
   0x4   :  { %s727_s18 = smov 0   ;;  %s729_s19 = smov 0  }
   0x5 LB: > { %s457_s20 = sadd.s32 4294967295, %s688_s19   ;;  %s458_s21 = sadd.s32 4294967294, %s688_s19   ;;  %s688_s19 = sphi %s729_s19, %s16_s19   ;;  %s684_s18 = sphi %s727_s18, %s885_s18   ;;  %s680_s17 = sphi %s725_s17, %s884_s17   ;;  %s676_s16 = sphi %s723_s16, %s883_s16   ;;  %s672_s15 = sphi %s721_s15, %s882_s15   ;;  %s668_s14 = sphi %s719_s14, %s881_s14   ;;  %s664_s13 = sphi %s717_s13, %s880_s13   ;;  %s660_s12 = sphi %s715_s12, %s879_s12  }
   0x6   : > { %s25_s22 = sadd.s32 1, %s680_s17  ;;  %s28_s23 = sadd.s32 1, %s684_s18 }
   0x7   : > { %p26_p0 = scmp.ge.s32.totalorder %s25_s22, 8  ;;  %p117_p1 = scmp.ne.s32.totalorder %s668_s14, %s664_s13 }
   0x8   : > { %p118_p2 = scmp.eq.s32.totalorder %s457_s20, 15  ;;  %p123_p5 = scmp.ne.s32.totalorder %s664_s13, %s660_s12 }
   0x9   : > { %s887_s22 = smov (%p26_p0, %s25_s22), 0  ;;  %s889_s23 = smov (!%p26_p0, %s28_s23), %s684_s18 }
   0xa   : > { %s103_s24 = ssub.s32 %s680_s17, %s887_s22  ;;  %p766_p3 = por %p118_p2, %p117_p1 }
   0xb   : > { %p30_p4 = scmp.ge.s32.totalorder %s889_s23, 2  ;;  %p124_p6 = scmp.eq.s32.totalorder %s458_s21, 15 }
   0xc   : > { %p461_p7 = scmp.ge.s32.totalorder %s688_s19, 1  ;;  %p160_p9 = scmp.lt.s32.totalorder %s688_s19, 17 }
   0xd   : > { %s891_s23 = smov (%p30_p4, %s889_s23), 0  ;;  %p775_p8 = por %p124_p6, %p123_p5 }
   0xe   : > { %s102_s27 = ssub.s32 %s684_s18, %s891_s23  ;;  %s107_s28 = sadd.s32 1, %s668_s14 }
   0xf   : > { %s104_s29 = sor.u32 %s103_s24, %s102_s27  ;;  %p161_p10 = pnand %p461_p7, %p160_p9 }
  0x10   : > { %p105_p11 = scmp.eq.s32.totalorder %s104_s29, 0  ;;  %p188_p12 = scmp.lt.s32.totalorder (!%p161_p10), %s676_s16, 1  ;;  %v690_v0 = vmov (!%p161_p10), 0.0|0.0   ;;  %v278_v1 = vld [vmem:[%s875_s2] sm:$0xff] (!%p161_p10)  ;;  %vm691_vm0 = vmmov (!%p161_p10), 0   ;;  %v692_v2 = vmov (!%p161_p10), 0.0  }
  0x11   : > { %164 = sbr.rel (%p161_p10) target bundleno = 475 (0x1db), region = 32  ;;  %p190_p13 = scmp.lt.s32.totalorder (!%p161_p10), %s672_s15, 7  ;;  %506 = vmatprep.subr.bf16.mxu0 (!%p161_p10), %v690_v0  ;;  %510 = vmatprep.subr.bf16.mxu1 (!%p161_p10), %v690_v0  ;;  %v279_v3 = vld [vmem:[%s875_s2 + $0x8] sm:$0xff] (!%p161_p10)  ;;  %v280_v4 = vld [vmem:[%s875_s2 + $0x10] sm:$0xff] (!%p161_p10)  ;;  %v281_v5 = vld [vmem:[%s875_s2 + $0x18] sm:$0xff] (!%p161_p10)  ;;  %vm204_vm1 = vcmask (!%p161_p10), 1041408  }
  0x12   : > { %s784_s30 = scalar_select %p105_p11, %s668_s14, %s107_s28  }
  0x13   : > { %488 = vmatprep.mubr.msk.f32.mxu0 (!%p161_p10), %vm691_vm0, %v692_v2  ;;  %503 = vmatprep.mubr.msk.f32.mxu1 (!%p161_p10), %vm691_vm0, %v692_v2  ;;  %v511_v6 = vpack.c.bf16 (!%p161_p10), %v279_v3, %v278_v1  ;;  %v514_v7 = vpack.c.bf16 (!%p161_p10), %v281_v5, %v280_v4  ;;  %v282_v8 = vld [vmem:[%s875_s2 + $0x20] sm:$0xff] (!%p161_p10)  ;;  %v283_v9 = vld [vmem:[%s875_s2 + $0x28] sm:$0xff] (!%p161_p10)  ;;  %vm693_vm2 = vmmov (!%p161_p10), 1   ;;  %vm200_vm4 = vcmask (!%p161_p10), 80896  }
  0x14   : > { %vm508_vm3 = vmpackc.low (!%p161_p10), %vm204_vm1, %vm693_vm2  ;;  %v517_v12 = vpack.c.bf16 (!%p161_p10), %v283_v9, %v282_v8  ;;  %v197_v14 = vld [vmem:[%s874_s1] sm:$0xf] (!%p161_p10)  ;;  %vm284_vm5 = vcmask (!%p161_p10), 392192   ;;  %vm358_vm6 = vcmask (!%p161_p10), 125952  }
  0x15   : > { %512 = vmatpush3.bf16.msra.mxu1 (!%p161_p10), %v511_v6 }
  0x16   : > { %513 = vmatprep.subr.bf16.mxu1 (!%p161_p10), %v690_v0 }
  0x18   : > { %s189_s6 = scalar_select %p188_p12, %s676_s16, 1 }
  0x19   : > { %s191_s21 = scalar_select %p190_p13, %s672_s15, 7  ;;  %515 = vmatpush3.bf16.msra.mxu1 %v514_v7 }
  0x1a   : > { %s464_s24 = sshll.u32 %s189_s6, 4  ;;  %516 = vmatprep.subr.bf16.mxu1 %v690_v0 }
  0x1b   : > { %s463_s27 = sshll.u32 %s191_s21, 1  ;;  %s185_s21 = sand.u32 1, %s664_s13  }
  0x1c   : > { %s194_s28 = sadd.s32 %s464_s24, %s463_s27  ;;  %s462_s24 = sshll.u32 %s185_s21, 2 }
  0x1d   : > { %s465_s8 = sshll.u32 %s194_s28, 3  ;;  %518 = vmatpush3.bf16.msra.mxu1 %v517_v12  ;;  %s470_s27 = sshll.u32 %s676_s16, 3 }
  0x1e   : > { %s196_s11 = scalar_lea.vmem %s873_s0, %s465_s8  ;;  %s372_s28 = sadd.s32 %s672_s15, %s470_s27 }
  0x1f   : > { %v198_v10 = vld [vmem:[%s196_s11] sm:$0xff]  ;;  %v199_v11 = vld [vmem:[%s196_s11 + $0x8] sm:$0x3]  ;;  %s471_s29 = sshll.u32 %s372_s28, 6  ;;  %s187_s4 = scalar_lea.vmem [#allocation2], %s462_s24 }
  0x20   : > { %v507_v13 = vpack.c.bf16 %v199_v11, %v198_v10  ;;  %s376_s5 = sshll.u32 %s187_s4, 4  ;;  %s820_s9 = scalar_lea.hbm %s876_s3, %s471_s29  ;;  %s822_s5 = int_to_ptr.vmem [resolvable:$true] %s376_s5 }
  0x21   : > { %s361_s10 = scalar_lea.sflag [#allocation3], %s185_s21  ;;  %s594_s16 = scalar_lea.vmem %s822_s5, 64 }
  0x22   : > { %509 = vmatpush3.bf16.msk.msra.mxu0 %vm508_vm3, %v507_v13  ;;  %p595_p0 = scmp.ne.s32.totalorder %s822_s5, %s594_s16  ;;  %s694_s15 = smov [#allocation2]  }
  0x23   : > { %s598_s11 = sshll.u32 %s694_s15, 4  ;;  %s599_s11 = int_to_ptr.vmem [resolvable:$false] %s598_s11 }
  0x24   : > { %p596_p1 = pnand %p595_p0, %p766_p3  ;;  %s600_s6 = scalar_lea.vmem %s599_s11, 128 }
  0x25   : > { %489 = vmatmul.mubr.msk.f32.vlgmr.msra.gmra.mrb[0].mxu0 %vm200_vm4, %v197_v14  ;;  %p601_p4 = scmp.lt.s32.totalorder %s822_s5, %s599_s11  ;;  %p602_p5 = scmp.lt.s32.totalorder %s600_s6, %s594_s16 }
  0x26   : > { %p597_p2 = pneg %p596_p1 }
  0x27   : > { %p603_p6 = por %p602_p5, %p601_p4 }
  0x29   : > { %p604_p7 = pnand %p603_p6, %p597_p2 }
  0xf8   : > { %v274_v15 = vpop.f32.mrb[0].mxu0 }
  0xf9   : > { %v490_v16 = vpop.f32.mrb[1].mxu0  ;;  %504 = vmatmul.mubr.msk.f32.vlgmr.msra.gmra.mrb[0].mxu1 %vm284_vm5, %v274_v15 }
 0x1cc   : > { %v354_v17 = vpop.f32.mrb[0].mxu1 }
 0x1cd   : > { %359 = vst.msk [vmem:[%s187_s4] sm:$0xf] %vm358_vm6, %v354_v17  ;;  %v505_v18 = vpop.f32.mrb[1].mxu1 }
 0x1ce   : > { %607 = shalt.err (!%p604_p7)
}
 0x1cf   : > { %s608_s20 = scalar_lea.hbm %s820_s9, 64  ;;  %s612_s27 = scalar_lea.hbm %s876_s3, 1024 }
 0x1d0   : > { %p609_p9 = scmp.ne.s32.totalorder %s820_s9, %s608_s20  ;;  %p613_p12 = scmp.lt.u32.totalorder %s820_s9, %s876_s3 }
 0x1d1   : > { %p614_p13 = scmp.lt.u32.totalorder %s612_s27, %s608_s20  ;;  %p616_p1 = scmp.lt.u32.totalorder %s608_s20, %s820_s9 }
 0x1d2   : > { %p610_p10 = pnand %p609_p9, %p766_p3 }
 0x1d3   : > { %p615_p0 = por %p614_p13, %p613_p12 }
 0x1d4   : > { %p611_p11 = pneg %p610_p10 }
 0x1d5   : > { %p617_p2 = por %p616_p1, %p615_p0 }
 0x1d7   : > { %p618_p4 = pnand %p617_p2, %p611_p11 }
 0x1d9   : > { %621 = shalt.err (!%p618_p4)
}
 0x1da   : > { %519 = dma.vmem_to_hbm [thread:$0]  (%p766_p3), %s822_s5, 64, %s820_s9, %s361_s10  }
 0x1db PF: > { %p525_p5 = scmp.ge.s32.totalorder %s688_s19, 2  ;;  %s388_s4 = sand.u32 1, %s660_s12  }
 0x1dc   : > { %s389_s7 = scalar_lea.sflag [#allocation3], %s388_s4 }
 0x1dd   : > { %p522_p6 = pnand %p525_p5, %p775_p8 }
 0x1df   : > { %655 = dma.done.wait (!%p522_p6), %s389_s7, 64  }
 0x1e0   : > { %657 = vsyncadd (!%p522_p6), %s389_s7, 4294967232  ;;  %s16_s19 = sadd.s32 1, %s688_s19   ;;  %s879_s12 = smov %s664_s13 }
 0x1e1   : > { %p13_p7 = scmp.ge.s32.totalorder %s16_s19, 18   ;;  %s880_s13 = smov %s668_s14 }
 0x1e2   : > { %s881_s14 = smov %s784_s30  ;;  %s882_s15 = smov %s680_s17 }
 0x1e3   : > { %s883_s16 = smov %s684_s18  ;;  %s884_s17 = smov %s887_s22 }
 0x1e4   : > { %s885_s18 = smov %s891_s23  ;;  %15 = sbr.rel (!%p13_p7) target bundleno = 5 (0x5), region = 67 }
 0x1eb   :  { %394 = vsyncpa [#allocation3], 1 }
 0x1ec   :  { %396 = vsyncpa [#allocation3 + $0x1], 1 }

</bundles_post_ra>
